<compile_context>
chip_gen: v7x
topology: tpu7x:2x2x1
jax: 0.10.0
libtpu: 0.0.40
codegen_flags: <defaults>
</compile_context>

<pallas_src>
import functools

import jax
import jax.numpy as jnp
from jax import lax
from jax.experimental import pallas as pl
from jax.experimental.pallas import tpu as pltpu


def _norm_kernel(uidx_ref, x_ref, params_ref, o_ref, *, rt):
    """One (unmasked-image, row-tile, lane-tile) block.

    uidx_ref   : SMEM (SU,) int32  -- unmasked sequence indices (consumed only
                                      by the index_maps, unused here)
    x_ref      : VMEM (1, Rt, Lt)  -- input block (rows = N*C, lanes = H*W)
    params_ref : VMEM (R, 2) f32   -- resident per-row [mean, inv_std] table
    o_ref      : VMEM (1, Rt, Lt)
    """
    del uidx_ref
    # Row offset of this tile inside the resident params table.  Rt is either
    # a multiple of 8 or the full row extent (in which case the offset is 0),
    # so the start is always 8-aligned.
    r0 = pl.multiple_of(pl.program_id(1) * rt, 8)
    p = params_ref[pl.ds(r0, rt), :]               # (Rt, 2)
    mean = p[:, 0:1]                               # (Rt, 1) broadcasts over lanes
    istd = p[:, 1:2]
    x = x_ref[...].astype(jnp.float32)             # (1, Rt, Lt)
    o_ref[...] = ((x - mean) * istd).astype(o_ref.dtype)


def _vmem_budget():
    """Return (block byte budget, scoped vmem limit, physical vmem capacity)."""
    try:
        cap = int(getattr(pltpu.get_tpu_info(), "vmem_capacity_bytes",
                          64 * 1024 * 1024))
    except Exception:           # query unavailable -> be conservative (v7x-safe)
        cap = 64 * 1024 * 1024
    if cap >= 100 * 1024 * 1024:        # v5e / v6e: 128 MiB VMEM per core
        return 8 * 1024 * 1024, 64 * 1024 * 1024, cap
    return 4 * 1024 * 1024, 32 * 1024 * 1024, cap   # v7x: 64 MiB per core


def _pick_tiles(R, L, itemsize, max_block_bytes):
    """Pick (Rt, Lt): divisors of (R, L) honoring the (8,128) tiling rule and a
    byte budget.  Prefers full-L blocks (lane-dense, unmasked vst stores)."""
    if R * L * itemsize <= max_block_bytes:
        return R, L
    if R % 8 == 0:                       # row-tile, keep the full lane extent
        best, t = 0, 8
        while t <= R:
            if R % t == 0 and t * L * itemsize <= max_block_bytes:
                best = t
            t += 8
        if best:
            return best, L
    rt = 8 if R % 8 == 0 else R
    if L % 128 == 0:                     # lane-tile as well
        best, t = 0, 128
        while t <= L:
            if L % t == 0 and rt * t * itemsize <= max_block_bytes:
                best = t
            t += 128
        if best:
            return rt, best
    # TODO(synk): large images whose dims are not (8,128)-tileable are not
    # split further; the wrapper raises the VMEM limit (or errors cleanly)
    # instead of padding / emitting masked tail stores.
    return rt, L


def batch_transform_mask(imgs, mask_indices=(), *, max_block_bytes=None):
    """Forward pass of BaseBatchTransform_Mask for a stacked Sequence of images.

    imgs         : (S, N, C, H, W) -- stacked NCHW image batches
    mask_indices : static python sequence of int; those sequence indices get
                   _mask=True (identity pass-through)
    returns      : (S, N, C, H, W), same dtype as `imgs`

    The output aliases the input buffer (masked images are never DMA'd); call
    under jit with donate_argnums on `imgs` to avoid a defensive XLA copy.
    """
    if imgs.ndim == 4:                       # single (non-Sequence) image path
        return batch_transform_mask(imgs[None], ())[0]

    S, N, C, H, W = imgs.shape
    R, L = N * C, H * W

    masked = {int(i) for i in mask_indices}
    unmasked = [i for i in range(S) if i not in masked]
    if not unmasked:                         # every image masked -> identity
        return imgs

    # -- get_transform_params(imgs[0]): one-pass per-channel mean / inv-std --
    ref0 = imgs[0].astype(jnp.float32)                        # (N, C, H, W)
    m1 = jnp.mean(ref0, axis=(0, 2, 3))                       # (C,)  E[x]
    m2 = jnp.mean(ref0 * ref0, axis=(0, 2, 3))                # (C,)  E[x^2]
    istd = lax.rsqrt(jnp.maximum(m2 - m1 * m1, 0.0) + 1e-6)   # (C,)
    # Row r of the (N*C, H*W) view maps to channel r % C.
    params = jnp.stack([jnp.tile(m1, N), jnp.tile(istd, N)], axis=1)  # (R, 2)

    # Keep NCHW: merging (N,C) and (H,W) is a free view (no transpose).
    x = imgs.reshape(S, R, L)
    uidx = jnp.asarray(unmasked, dtype=jnp.int32)             # gather indices
    SU = len(unmasked)

    budget, vmem_limit, vmem_cap = _vmem_budget()
    if max_block_bytes is not None:
        budget = max_block_bytes
    Rt, Lt = _pick_tiles(R, L, imgs.dtype.itemsize, budget)

    # Double-buffered in + out blocks plus the resident params table.
    block_bytes = Rt * Lt * imgs.dtype.itemsize
    needed = 4 * block_bytes + 2 * (R * 2 * 4) + (1 << 20)
    vmem_limit = max(vmem_limit, needed)
    if vmem_limit > vmem_cap:
        raise ValueError(
            f"block {Rt}x{Lt} needs ~{needed >> 20} MiB of VMEM, more than the "
            f"{vmem_cap >> 20} MiB available; lower max_block_bytes")

    # TODO(synk): for images much smaller than the budget, several sequence
    # steps could be folded into one block to amortize the ~0.35us/step cost,
    # but that is incompatible with the gather over non-contiguous unmasked
    # indices used here.
    grid = (SU, R // Rt, L // Lt)

    out = pl.pallas_call(
        functools.partial(_norm_kernel, rt=Rt),
        out_shape=jax.ShapeDtypeStruct((S, R, L), imgs.dtype),
        grid_spec=pltpu.PrefetchScalarGridSpec(
            num_scalar_prefetch=1,               # unmasked-index vector -> SMEM
            grid=grid,
            in_specs=[
                # Gather: only unmasked images are ever DMA'd.
                pl.BlockSpec((1, Rt, Lt), lambda s, r, l, u: (u[s], r, l)),
                # Shared params: constant block index -> DMA'd once, resident.
                pl.BlockSpec((R, 2), lambda s, r, l, u: (0, 0)),
            ],
            out_specs=pl.BlockSpec((1, Rt, Lt),
                                   lambda s, r, l, u: (u[s], r, l)),
        ),
        compiler_params=pltpu.CompilerParams(
            # No carried state -> every axis independent (megacore on v7x).
            dimension_semantics=("parallel", "parallel", "parallel"),
            vmem_limit_bytes=int(vmem_limit),
        ),
        # x (flat input index 1, counting the scalar-prefetch vector) aliases
        # output 0: masked images are already in the buffer and never touched.
        input_output_aliases={1: 0},
    )(uidx, x, params)

    return out.reshape(S, N, C, H, W)


def _reference(imgs, mask_indices):
    """Pure-JAX reference of the same semantics."""
    ref0 = imgs[0].astype(jnp.float32)                        # (N, C, H, W)
    mean = jnp.mean(ref0, axis=(0, 2, 3), keepdims=True)      # per-channel
    var = jnp.mean((ref0 - mean) ** 2, axis=(0, 2, 3), keepdims=True)
    istd = lax.rsqrt(var + 1e-6)
    outs = []
    for i in range(imgs.shape[0]):
        if i in mask_indices:
            outs.append(imgs[i])
        else:
            outs.append(((imgs[i].astype(jnp.float32) - mean) * istd)
                        .astype(imgs.dtype))
    return jnp.stack(outs, axis=0)


if __name__ == "__main__":
    key = jax.random.PRNGKey(0)
    S, N, C, H, W = 3, 2, 4, 16, 16            # sequence of 3 NCHW image batches
    imgs = jax.random.normal(key, (S, N, C, H, W), dtype=jnp.float32) * 2.0 + 0.5
    mask = (1,)                                # imgs[1] gets _mask=True (identity)

    expected = _reference(imgs, mask)

    # Donate the image buffer so the aliased output reuses it (no defensive copy).
    fwd = jax.jit(functools.partial(batch_transform_mask, mask_indices=mask),
                  donate_argnums=0)
    out = jax.block_until_ready(fwd(jnp.copy(imgs)))

    assert out.shape == imgs.shape and out.dtype == imgs.dtype
    assert jnp.allclose(out, expected, atol=1e-4, rtol=1e-4)
    assert bool(jnp.array_equal(out[1], imgs[1]))   # masked image is untouched

    print("KERNEL_OK")
</pallas_src>

<mosaic_0001>
module attributes {stable_mosaic.version = 11 : i64} {
  func.func @_norm_kernel(%arg0: i32, %arg1: i32, %arg2: i32, %arg3: memref<2xi32, #tpu.memory_space<smem>>, %arg4: memref<1x8x256xf32, #tpu.memory_space<vmem>>, %arg5: memref<8x2xf32, #tpu.memory_space<vmem>>, %arg6: memref<1x8x256xf32, #tpu.memory_space<vmem>>) attributes {dimension_semantics = [#tpu.dimension_semantics<parallel>, #tpu.dimension_semantics<parallel>, #tpu.dimension_semantics<parallel>], iteration_bounds = array<i64: 2, 1, 1>, scalar_prefetch = 1 : i64, scratch_operands = 0 : i64, tpu.core_type = #tpu.core_type<tc>, window_params = [{transform_indices = @transform_0, window_bounds = array<i64: 1, 8, 256>}, {pipeline_mode = #tpu.pipeline_mode<synchronous>, transform_indices = @transform_1, window_bounds = array<i64: 8, 2>}, {transform_indices = @transform_2, window_bounds = array<i64: 1, 8, 256>}]} {
    %c8_i32 = arith.constant 8 : i32
    %0 = arith.muli %arg1, %c8_i32 : i32
    %1 = tpu.assume_multiple %0, 8 : i32
    %2 = arith.index_cast %1 : i32 to index
    %c0 = arith.constant 0 : index
    %3 = vector.load %arg5[%2, %c0] : memref<8x2xf32, #tpu.memory_space<vmem>>, vector<8x2xf32>
    %4 = vector.extract_strided_slice %3 {offsets = [0, 0], sizes = [8, 1], strides = [1, 1]} : vector<8x2xf32> to vector<8x1xf32>
    %5 = vector.extract_strided_slice %3 {offsets = [0, 1], sizes = [8, 1], strides = [1, 1]} : vector<8x2xf32> to vector<8x1xf32>
    %c0_0 = arith.constant 0 : index
    %c0_1 = arith.constant 0 : index
    %c0_2 = arith.constant 0 : index
    %6 = vector.load %arg4[%c0_0, %c0_1, %c0_2] : memref<1x8x256xf32, #tpu.memory_space<vmem>>, vector<1x8x256xf32>
    %7 = vector.shape_cast %4 : vector<8x1xf32> to vector<1x8x1xf32>
    %8 = vector.broadcast %7 : vector<1x8x1xf32> to vector<1x8x256xf32>
    %9 = arith.subf %6, %8 : vector<1x8x256xf32>
    %10 = vector.shape_cast %5 : vector<8x1xf32> to vector<1x8x1xf32>
    %11 = vector.broadcast %10 : vector<1x8x1xf32> to vector<1x8x256xf32>
    %12 = arith.mulf %9, %11 : vector<1x8x256xf32>
    %c0_3 = arith.constant 0 : index
    %c0_4 = arith.constant 0 : index
    %c0_5 = arith.constant 0 : index
    %13 = vector.load %arg6[%c0_3, %c0_4, %c0_5] : memref<1x8x256xf32, #tpu.memory_space<vmem>>, vector<1x8x256xf32>
    tpu.vector_store %arg6[%c0_3, %c0_4, %c0_5], %12 {strides = array<i32>} : memref<1x8x256xf32, #tpu.memory_space<vmem>>, vector<1x8x256xf32>,
    return
  }
  func.func @transform_0(%arg0: i32, %arg1: i32, %arg2: i32, %arg3: memref<2xi32, #tpu.memory_space<smem>>) -> (i32, i32, i32) {
    %0 = arith.index_cast %arg0 : i32 to index
    %1 = memref.load %arg3[%0] : memref<2xi32, #tpu.memory_space<smem>>
    %c0_i32 = arith.constant 0 : i32
    return %1, %arg1, %arg2 : i32, i32, i32
  }
  func.func @transform_1(%arg0: i32, %arg1: i32, %arg2: i32, %arg3: memref<2xi32, #tpu.memory_space<smem>>) -> (i32, i32) {
    %c0_i32 = arith.constant 0 : i32
    %c0_i32_0 = arith.constant 0 : i32
    %c0_i32_1 = arith.constant 0 : i32
    return %c0_i32, %c0_i32_0 : i32, i32
  }
  func.func @transform_2(%arg0: i32, %arg1: i32, %arg2: i32, %arg3: memref<2xi32, #tpu.memory_space<smem>>) -> (i32, i32, i32) {
    %0 = arith.index_cast %arg0 : i32 to index
    %1 = memref.load %arg3[%0] : memref<2xi32, #tpu.memory_space<smem>>
    %c0_i32 = arith.constant 0 : i32
    return %1, %arg1, %arg2 : i32, i32, i32
  }
}

</mosaic_0001>

<bundles_post_ra>
// kernel: tile.17
= control target key start
LH: loop header
LB: loop body
LE: loop exit
PB: predicated region body
PF: predicated region fallthrough
CT: control target
= control target key end

     0   :  { %s22_s0 = inlined_call_operand.vmem [shape: f32[4], index: 0, kind: input, shape index: {}]   ;;  %s23_s1 = inlined_call_operand.vmem [shape: f32[2,4], index: 1, kind: output, shape index: {}]  }
   0x1   :  { %v4_v0 = vld [vmem:[%s22_s0] ss:$0 sm:$0xff] }
   0x2   :  { %5 = vst [vmem:[%s23_s1] sm:$0x3] %v4_v0 }

// kernel: tile.19
= control target key start
LH: loop header
LB: loop body
LE: loop exit
PB: predicated region body
PF: predicated region fallthrough
CT: control target
= control target key end

     0   :  { %vm7_vm0 = vcmask 31744   ;;  %vm13_vm1 = vcmask 64544   ;;  %s39_s0 = inlined_call_operand.vmem [shape: f32[2,4], index: 0, kind: input, shape index: {}]   ;;  %s40_s1 = inlined_call_operand.vmem [shape: f32[8,1], index: 1, kind: output, shape index: {}]  }
   0x1   :  { %v4_v0 = vld [vmem:[%s39_s0] sm:$0x3]  ;;  %s22_s0 = smov 4  }
   0x2   :  { %5 = vst [vmem:[#allocation1] sm:$0x3] %v4_v0 }
   0x9   :  { %v10_v1 = vld [vmem:[#allocation1 + $0x1] sm:$0x1]   ;;  %v6_v2 = vld [vmem:[#allocation1] sm:$0x1]  }
   0xa   :  { %11 = vrot.lane.b32.xlu0 %v10_v1, %s22_s0  ;;  %8 = vst.msk [vmem:[#allocation0] sm:$0x1] %vm7_vm0, %v6_v2  }
  0x7c   :  { %v12_v3 = vpop.permute.xlu0 %11  }
  0x7d   :  { %14 = vst.msk [vmem:[#allocation0] sm:$0x1] %vm13_vm1, %v12_v3  }
  0x84   :  { %v18_v4 = vld [vmem:[#allocation0] sm:$0x1] }
  0x85   :  { %20 = vst [vmem:[%s40_s1] sm:$0x1] %v18_v4 }

// kernel: batch_transform_mask.1
= control target key start
LH: loop header
LB: loop body
LE: loop exit
PB: predicated region body
PF: predicated region fallthrough
CT: control target
= control target key end

     0   :  { %s512_s0 = inlined_call_operand.vmem [shape: s32[2], index: 0, kind: input, shape index: {}]   ;;  %s513_s1 = inlined_call_operand.vmem [shape: f32[3,8,256], index: 1, kind: input, shape index: {}, may-alias: {1,3}]   ;;  %s514_s2 = inlined_call_operand.vmem [shape: f32[8,2], index: 2, kind: input, shape index: {}]   ;;  %s515_s3 = inlined_call_operand.vmem [shape: f32[3,8,256], index: 3, kind: output, shape index: {}, may-alias: {1,3}]  }
   0x1   :  { %s8_s14 = sshll.u32 %s512_s0, 4  ;;  %s9_s14 = int_to_ptr.vmem [resolvable:$true] %s8_s14 }
   0x2   :  { %s412_s15 = scalar_lea.vmem %s9_s14, 16  ;;  %p417_p1 = scmp.lt.s32.totalorder %s9_s14, %s9_s14 }
   0x3   :  { %p413_p0 = scmp.ne.s32.totalorder %s9_s14, %s412_s15  ;;  %p418_p2 = scmp.lt.s32.totalorder %s412_s15, %s412_s15 }
   0x5   :  { %p419_p3 = por %p418_p2, %p417_p1 }
   0x7   :  { %p420_p4 = pnand %p419_p3, %p413_p0 }
   0x9   :  { %423 = shalt.err (!%p420_p4)  }
   0xa   :  { %s450_s16 = smov [#allocation3]  }
   0xb   :  { %11 = dma.vmem_to_smem %s9_s14, 16, %s450_s16, [#allocation2] }
   0xc   :  { %436 = dma.done.wait [#allocation2], 16 }
   0xd   :  { %437 = vsyncadd [#allocation2], 4294967280 }
   0xe   :  { %13 = sfence }
   0xf   :  { %s476_s17 = smov 0   ;;  %s478_s18 = smov 0  }
  0x10   :  { %s480_s19 = smov 0  }
  0x11 LB: > { %s38_s0 = sadd.s32 1, %s444_s18  ;;  %p374_p5 = scmp.ge.s32.totalorder %s448_s19, 1  ;;  %s448_s19 = sphi %s480_s19, %s19_s19   ;;  %s444_s18 = sphi %s478_s18, %s517_s18   ;;  %s440_s17 = sphi %s476_s17, %s516_s17  }
  0x12   : > { %p40_p6 = scmp.ge.s32.totalorder %s38_s0, 2  ;;  %p161_p7 = scmp.lt.s32.totalorder %s448_s19, 3 }
  0x14   : > { %s519_s0 = smov (%p40_p6, %s38_s0), 0  ;;  %p162_p8 = pnand %p374_p5, %p161_p7 }
  0x15   : > { %v235_v0 = vld [vmem:[%s514_s2] sm:$0xff] (!%p162_p8)  ;;  %v451_v1 = vmov (!%p162_p8), 0   ;;  %v452_v2 = vmov (!%p162_p8), 1   ;;  %s201_s22 = sld [smem:[#allocation3 + %s440_s17]] (!%p162_p8) }
  0x16   : > { %165 = sbr.rel (%p162_p8) target bundleno = 159 (0x9f), region = 28  ;;  %410 = vset.pattern.permute.xlu0 (!%p162_p8), %v451_v1  ;;  %s217_s23 = sld [smem:[#allocation3 + %s440_s17]] (!%p162_p8) }
  0x17   : > { %240 = vperm.xlu0 (!%p162_p8), %410, %v235_v0  }
  0x1b   : > { %411 = vset.pattern.permute.xlu0 (!%p162_p8), %v452_v2  ;;  %p203_p9 = scmp.lt.s32.totalorder (!%p162_p8), %s201_s22, 2 }
  0x1c   : > { %246 = vperm.xlu0 (!%p162_p8), %411, %v235_v0   ;;  %p219_p10 = scmp.lt.s32.totalorder (!%p162_p8), %s217_s23, 2 }
  0x1d   : > { %s521_s22 = smov (!%p203_p9, %s201_s22), 2 }
  0x1e   : > { %s381_s24 = sshll.u32 %s521_s22, 4  ;;  %s523_s23 = smov (!%p219_p10, %s217_s23), 2 }
  0x1f   : > { %s214_s27 = scalar_lea.vmem %s513_s1, %s381_s24  ;;  %s382_s28 = sshll.u32 %s523_s23, 4 }
  0x20   : > { %v236_v4 = vld [vmem:[%s214_s27] sm:$0xff]  ;;  %v237_v5 = vld [vmem:[%s214_s27 + $0x8] sm:$0xff]  ;;  %s230_s4 = scalar_lea.vmem %s515_s3, %s382_s28 }
  0x96   : > { %v241_v3 = vpop.permute.xlu0 %240 }
  0x97   : > { %v243_v6 = vsub.f32 %v236_v4, %v241_v3  ;;  %v244_v7 = vsub.f32 %v237_v5, %v241_v3 }
  0x9b   : > { %v247_v8 = vpop.permute.xlu0 %246 }
  0x9c   : > { %v249_v9 = vmul.f32 %v247_v8, %v243_v6  ;;  %v250_v10 = vmul.f32 %v247_v8, %v244_v7 }
  0x9e   : > { %251 = vst [vmem:[%s230_s4] sm:$0xff] %v249_v9  ;;  %252 = vst [vmem:[%s230_s4 + $0x8] sm:$0xff] %v250_v10 }
  0x9f PF: > { %s19_s19 = sadd.s32 1, %s448_s19   ;;  %s516_s17 = smov %s444_s18 }
  0xa0   : > { %p16_p11 = scmp.ge.s32.totalorder %s19_s19, 4   ;;  %s517_s18 = smov %s519_s0 }
  0xa2   :  { %18 = sbr.rel (!%p16_p11) target bundleno = 17 (0x11), region = 59 }

</bundles_post_ra>
